<compile_context>
chip_gen: v7x
topology: tpu7x:2x2x1
jax: 0.10.0
libtpu: 0.0.40
codegen_flags: <defaults>
</compile_context>

<pallas_src>
import functools

import jax
import jax.numpy as jnp
from jax import lax
from jax.experimental import pallas as pl
from jax.experimental.pallas import tpu as pltpu


def _round_up(x: int, m: int) -> int:
    return ((x + m - 1) // m) * m


def sparse_ffn_kernel(x_ref, w1_ref, b1_ref, w2r_ref, b2_ref, o_ref):
    # x_ref:   (TILE_N, C_pad)   dense (padded) view of the coalesced sparse input
    # w1_ref:  (H_pad, C_pad)    lin1.weight (untransposed)
    # b1_ref:  (1, H_pad)        lin1.bias
    # w2r_ref: (H_pad, H_pad)    lin2.weight + I  (residual folded in)
    # b2_ref:  (1, H_pad)        lin2.bias
    # o_ref:   (TILE_N, H_pad)
    x = x_ref[...]

    # sparse_dropout with training=False is an identity on the stored values.
    # TODO(synk): training-mode sparse dropout (p=0.5, 2x rescale on nonzeros) not implemented.

    # h = relu(x @ W1^T + b1): contract x's axis 1 with W1's axis 1 (no transpose op).
    h = lax.dot_general(
        x, w1_ref[...],
        dimension_numbers=(((1,), (1,)), ((), ())),
        preferred_element_type=jnp.float32)
    h = jnp.maximum(h + b1_ref[...], 0.0)

    # out = h @ (W2 + I)^T + b2 == h @ W2^T + h + b2  (residual absorbed by the MXU).
    out = lax.dot_general(
        h, w2r_ref[...],
        dimension_numbers=(((1,), (1,)), ((), ())),
        preferred_element_type=jnp.float32)
    o_ref[...] = (out + b2_ref[...]).astype(o_ref.dtype)


def sparse_ffn(x_dense, w1, b1, w2, b2):
    """x_dense: [N, C_in] float32 (dense form of the coalesced sparse COO tensor).
    w1: [H, C_in], b1: [H], w2: [H, H], b2: [H]  (PyTorch nn.Linear conventions)."""
    N, C_in = x_dense.shape
    H = w1.shape[0]

    # Lane-dense padding: last dims up to a multiple of 128 lanes, rows to 8 sublanes.
    C_pad = _round_up(C_in, 128)
    H_pad = _round_up(H, 128)
    n8 = _round_up(N, 8)
    TILE_N = min(n8, 256)            # row tile; weights stay resident across the grid
    N_pad = _round_up(n8, TILE_N)

    x_p = jnp.zeros((N_pad, C_pad), x_dense.dtype).at[:N, :C_in].set(x_dense)
    w1_p = jnp.zeros((H_pad, C_pad), w1.dtype).at[:H, :C_in].set(w1)
    b1_p = jnp.zeros((1, H_pad), b1.dtype).at[0, :H].set(b1)
    # Fold the residual: (W2 + I) so the kernel never needs the explicit "+ h".
    w2r = w2 + jnp.eye(H, dtype=w2.dtype)
    w2r_p = jnp.zeros((H_pad, H_pad), w2.dtype).at[:H, :H].set(w2r)
    b2_p = jnp.zeros((1, H_pad), b2.dtype).at[0, :H].set(b2)

    grid = (N_pad // TILE_N,)

    out_p = pl.pallas_call(
        sparse_ffn_kernel,
        out_shape=jax.ShapeDtypeStruct((N_pad, H_pad), jnp.float32),
        grid=grid,
        in_specs=[
            pl.BlockSpec((TILE_N, C_pad), lambda i: (i, 0)),   # x tile (pipelined over rows)
            pl.BlockSpec((H_pad, C_pad), lambda i: (0, 0)),    # W1 resident
            pl.BlockSpec((1, H_pad), lambda i: (0, 0)),        # b1 resident
            pl.BlockSpec((H_pad, H_pad), lambda i: (0, 0)),    # W2 + I resident
            pl.BlockSpec((1, H_pad), lambda i: (0, 0)),        # b2 resident
        ],
        out_specs=pl.BlockSpec((TILE_N, H_pad), lambda i: (i, 0)),
        compiler_params=pltpu.CompilerParams(
            dimension_semantics=("parallel",),                 # v7x: split rows across 2 TCs
        ),
    )(x_p, w1_p, b1_p, w2r_p, b2_p)

    # Slice padding back off outside the kernel.
    return out_p[:N, :H]


if __name__ == "__main__":
    key = jax.random.PRNGKey(0)
    k_x, k_mask, k_w1, k_b1, k_w2, k_b2 = jax.random.split(key, 6)

    N = 8            # number of rows in the sparse matrix
    C_IN = 16        # in_channels
    H = 32           # hidden_channels

    # Build a "sparse" input: dense values with ~70% of entries zeroed
    # (exactly what the COO tensor densifies to).
    vals = jax.random.normal(k_x, (N, C_IN), dtype=jnp.float32)
    mask = jax.random.bernoulli(k_mask, p=0.3, shape=(N, C_IN))
    x_dense = jnp.where(mask, vals, 0.0)

    # Deterministic nn.Linear-style params.
    bound1 = 1.0 / jnp.sqrt(C_IN)
    bound2 = 1.0 / jnp.sqrt(H)
    w1 = jax.random.uniform(k_w1, (H, C_IN), jnp.float32, -bound1, bound1)
    b1 = jax.random.uniform(k_b1, (H,), jnp.float32, -bound1, bound1)
    w2 = jax.random.uniform(k_w2, (H, H), jnp.float32, -bound2, bound2)
    b2 = jax.random.uniform(k_b2, (H,), jnp.float32, -bound2, bound2)

    sparse_ffn_jit = jax.jit(sparse_ffn)
    out = sparse_ffn_jit(x_dense, w1, b1, w2, b2)
    out = jax.block_until_ready(out)

    # Pure-JAX reference check (residual is the relu'd hidden, as in the module).
    h_ref = jnp.maximum(x_dense @ w1.T + b1, 0.0)
    ref = h_ref @ w2.T + b2 + h_ref
    assert out.shape == (N, H)
    assert jnp.allclose(out, ref, atol=1e-5, rtol=1e-5), "mismatch vs reference"

    print("KERNEL_OK")
</pallas_src>

<mosaic_0001>
module attributes {stable_mosaic.version = 11 : i64} {
  func.func @sparse_ffn_kernel(%arg0: i32, %arg1: memref<8x128xf32, #tpu.memory_space<vmem>>, %arg2: memref<128x128xf32, #tpu.memory_space<vmem>>, %arg3: memref<1x128xf32, #tpu.memory_space<vmem>>, %arg4: memref<128x128xf32, #tpu.memory_space<vmem>>, %arg5: memref<1x128xf32, #tpu.memory_space<vmem>>, %arg6: memref<8x128xf32, #tpu.memory_space<vmem>>) attributes {dimension_semantics = [#tpu.dimension_semantics<parallel>], iteration_bounds = array<i64: 1>, scalar_prefetch = 0 : i64, scratch_operands = 0 : i64, tpu.core_type = #tpu.core_type<tc>, window_params = [{transform_indices = @transform_0, window_bounds = array<i64: 8, 128>}, {pipeline_mode = #tpu.pipeline_mode<synchronous>, transform_indices = @transform_1, window_bounds = array<i64: 128, 128>}, {pipeline_mode = #tpu.pipeline_mode<synchronous>, transform_indices = @transform_2, window_bounds = array<i64: 1, 128>}, {pipeline_mode = #tpu.pipeline_mode<synchronous>, transform_indices = @transform_3, window_bounds = array<i64: 128, 128>}, {pipeline_mode = #tpu.pipeline_mode<synchronous>, transform_indices = @transform_4, window_bounds = array<i64: 1, 128>}, {transform_indices = @transform_5, window_bounds = array<i64: 8, 128>}]} {
    %c0 = arith.constant 0 : index
    %c0_0 = arith.constant 0 : index
    %0 = vector.load %arg1[%c0, %c0_0] : memref<8x128xf32, #tpu.memory_space<vmem>>, vector<8x128xf32>
    %c0_1 = arith.constant 0 : index
    %c0_2 = arith.constant 0 : index
    %1 = vector.load %arg2[%c0_1, %c0_2] : memref<128x128xf32, #tpu.memory_space<vmem>>, vector<128x128xf32>
    %cst = arith.constant dense<0.000000e+00> : vector<8x128xf32>
    %2 = tpu.matmul %0, %1, %cst {dimension_numbers = #tpu.dot_dimension_numbers<[1], [1], [0], [0], [0, 0, 1, 0], [], []>} : vector<8x128xf32>, vector<128x128xf32>, vector<8x128xf32> -> vector<8x128xf32>
    %c0_3 = arith.constant 0 : index
    %c0_4 = arith.constant 0 : index
    %3 = vector.load %arg3[%c0_3, %c0_4] : memref<1x128xf32, #tpu.memory_space<vmem>>, vector<1x128xf32>
    %4 = vector.broadcast %3 : vector<1x128xf32> to vector<8x128xf32>
    %5 = arith.addf %2, %4 : vector<8x128xf32>
    %cst_5 = arith.constant 0.000000e+00 : f32
    %6 = vector.broadcast %cst_5 : f32 to vector<8x128xf32>
    %7 = arith.maximumf %5, %6 : vector<8x128xf32>
    %c0_6 = arith.constant 0 : index
    %c0_7 = arith.constant 0 : index
    %8 = vector.load %arg4[%c0_6, %c0_7] : memref<128x128xf32, #tpu.memory_space<vmem>>, vector<128x128xf32>
    %cst_8 = arith.constant dense<0.000000e+00> : vector<8x128xf32>
    %9 = tpu.matmul %7, %8, %cst_8 {dimension_numbers = #tpu.dot_dimension_numbers<[1], [1], [0], [0], [0, 0, 1, 0], [], []>} : vector<8x128xf32>, vector<128x128xf32>, vector<8x128xf32> -> vector<8x128xf32>
    %c0_9 = arith.constant 0 : index
    %c0_10 = arith.constant 0 : index
    %10 = vector.load %arg5[%c0_9, %c0_10] : memref<1x128xf32, #tpu.memory_space<vmem>>, vector<1x128xf32>
    %11 = vector.broadcast %10 : vector<1x128xf32> to vector<8x128xf32>
    %12 = arith.addf %9, %11 : vector<8x128xf32>
    %c0_11 = arith.constant 0 : index
    %c0_12 = arith.constant 0 : index
    %13 = vector.load %arg6[%c0_11, %c0_12] : memref<8x128xf32, #tpu.memory_space<vmem>>, vector<8x128xf32>
    tpu.vector_store %arg6[%c0_11, %c0_12], %12 {strides = array<i32>} : memref<8x128xf32, #tpu.memory_space<vmem>>, vector<8x128xf32>,
    return
  }
  func.func @transform_0(%arg0: i32) -> (i32, i32) {
    %c0_i32 = arith.constant 0 : i32
    %c0_i32_0 = arith.constant 0 : i32
    return %arg0, %c0_i32 : i32, i32
  }
  func.func @transform_1(%arg0: i32) -> (i32, i32) {
    %c0_i32 = arith.constant 0 : i32
    %c0_i32_0 = arith.constant 0 : i32
    %c0_i32_1 = arith.constant 0 : i32
    return %c0_i32, %c0_i32_0 : i32, i32
  }
  func.func @transform_2(%arg0: i32) -> (i32, i32) {
    %c0_i32 = arith.constant 0 : i32
    %c0_i32_0 = arith.constant 0 : i32
    %c0_i32_1 = arith.constant 0 : i32
    return %c0_i32, %c0_i32_0 : i32, i32
  }
  func.func @transform_3(%arg0: i32) -> (i32, i32) {
    %c0_i32 = arith.constant 0 : i32
    %c0_i32_0 = arith.constant 0 : i32
    %c0_i32_1 = arith.constant 0 : i32
    return %c0_i32, %c0_i32_0 : i32, i32
  }
  func.func @transform_4(%arg0: i32) -> (i32, i32) {
    %c0_i32 = arith.constant 0 : i32
    %c0_i32_0 = arith.constant 0 : i32
    %c0_i32_1 = arith.constant 0 : i32
    return %c0_i32, %c0_i32_0 : i32, i32
  }
  func.func @transform_5(%arg0: i32) -> (i32, i32) {
    %c0_i32 = arith.constant 0 : i32
    %c0_i32_0 = arith.constant 0 : i32
    return %arg0, %c0_i32 : i32, i32
  }
}

</mosaic_0001>

<bundles_post_ra>
// kernel: sparse_ffn.1
= control target key start
LH: loop header
LB: loop body
LE: loop exit
PB: predicated region body
PF: predicated region fallthrough
CT: control target
= control target key end

     0   :  { %v406_v2 = vmov 0.0|0.0   ;;  %vm407_vm0 = vmmov 0   ;;  %v408_v4 = vmov 0.0   ;;  %s573_s0 = inlined_call_operand.vmem [shape: f32[8,128], index: 0, kind: input, shape index: {}]   ;;  %s574_s1 = inlined_call_operand.vmem [shape: f32[128,128], index: 1, kind: input, shape index: {}]   ;;  %s575_s2 = inlined_call_operand.vmem [shape: f32[1,128], index: 2, kind: input, shape index: {}]   ;;  %s576_s3 = inlined_call_operand.vmem [shape: f32[128,128], index: 3, kind: input, shape index: {}]   ;;  %s577_s4 = inlined_call_operand.vmem [shape: f32[1,128], index: 4, kind: input, shape index: {}]   ;;  %s578_s5 = inlined_call_operand.hbm [shape: f32[8,128], index: 5, kind: output, shape index: {}]  }
   0x1   :  { %v22_v0 = vld [vmem:[%s574_s1] sm:$0xff]  ;;  %v23_v1 = vld [vmem:[%s574_s1 + $0x8] sm:$0xff]  ;;  %330 = vmatprep.subr.bf16.mxu0 %v406_v2  ;;  %292 = vmatprep.mubr.msk.f32.mxu0 %vm407_vm0, %v408_v4  ;;  %v24_v5 = vld [vmem:[%s574_s1 + $0x10] sm:$0xff] }
   0x2   :  { %v331_v3 = vpack.c.bf16 %v23_v1, %v22_v0  ;;  %354 = vmatprep.subr.bf16.mxu1 %v406_v2  ;;  %327 = vmatprep.mubr.msk.f32.mxu1 %vm407_vm0, %v408_v4  ;;  %v25_v6 = vld [vmem:[%s574_s1 + $0x18] sm:$0xff]  ;;  %v116_v7 = vld [vmem:[%s576_s3] sm:$0xff]  ;;  %v117_v8 = vld [vmem:[%s576_s3 + $0x8] sm:$0xff] }
   0x3   :  { %v334_v9 = vpack.c.bf16 %v25_v6, %v24_v5  ;;  %v355_v10 = vpack.c.bf16 %v117_v8, %v116_v7  ;;  %v118_v11 = vld [vmem:[%s576_s3 + $0x10] sm:$0xff]  ;;  %v119_v12 = vld [vmem:[%s576_s3 + $0x18] sm:$0xff] }
   0x4   :  { %332 = vmatpush3.bf16.xpose.msra.mxu0 %v331_v3 }
   0x5   :  { %333 = vmatprep.subr.bf16.mxu0 %v406_v2  ;;  %356 = vmatpush3.bf16.xpose.msra.mxu1 %v355_v10 }
   0x6   :  { %357 = vmatprep.subr.bf16.mxu1 %v406_v2 }
   0xc   :  { %335 = vmatpush3.bf16.xpose.msra.mxu0 %v334_v9 }
   0xd   :  { %10 = vsyncpa [#allocation3], 0  ;;  %336 = vmatprep.subr.bf16.mxu0 %v406_v2  ;;  %v26_v13 = vld [vmem:[%s574_s1 + $0x20] sm:$0xff]  ;;  %v27_v14 = vld [vmem:[%s574_s1 + $0x28] sm:$0xff]  ;;  %v358_v15 = vpack.c.bf16 %v119_v12, %v118_v11 }
   0xe   :  { %v337_v16 = vpack.c.bf16 %v27_v14, %v26_v13  ;;  %v120_v17 = vld [vmem:[%s576_s3 + $0x20] sm:$0xff]  ;;  %v121_v18 = vld [vmem:[%s576_s3 + $0x28] sm:$0xff]  ;;  %v28_v19 = vld [vmem:[%s574_s1 + $0x30] sm:$0xff] }
   0xf   :  { %359 = vmatpush3.bf16.xpose.msra.mxu1 %v358_v15  ;;  %v29_v20 = vld [vmem:[%s574_s1 + $0x38] sm:$0xff]  ;;  %v361_v21 = vpack.c.bf16 %v121_v18, %v120_v17  ;;  %v122_v23 = vld [vmem:[%s576_s3 + $0x30] sm:$0xff]  ;;  %v30_v25 = vld [vmem:[%s574_s1 + $0x40] sm:$0xff] }
  0x10   :  { %360 = vmatprep.subr.bf16.mxu1 %v406_v2  ;;  %v340_v22 = vpack.c.bf16 %v29_v20, %v28_v19  ;;  %v123_v24 = vld [vmem:[%s576_s3 + $0x38] sm:$0xff]  ;;  %v31_v26 = vld [vmem:[%s574_s1 + $0x48] sm:$0xff]  ;;  %v124_v29 = vld [vmem:[%s576_s3 + $0x40] sm:$0xff] }
  0x11   :  { %v364_v27 = vpack.c.bf16 %v123_v24, %v122_v23  ;;  %v343_v28 = vpack.c.bf16 %v31_v26, %v30_v25  ;;  %v125_v30 = vld [vmem:[%s576_s3 + $0x48] sm:$0xff]  ;;  %v32_v31 = vld [vmem:[%s574_s1 + $0x50] sm:$0xff]  ;;  %v33_v32 = vld [vmem:[%s574_s1 + $0x58] sm:$0xff] }
  0x12   :  { %v367_v33 = vpack.c.bf16 %v125_v30, %v124_v29  ;;  %v346_v34 = vpack.c.bf16 %v33_v32, %v32_v31  ;;  %v126_v35 = vld [vmem:[%s576_s3 + $0x50] sm:$0xff]  ;;  %v127_v36 = vld [vmem:[%s576_s3 + $0x58] sm:$0xff]  ;;  %v34_v37 = vld [vmem:[%s574_s1 + $0x60] sm:$0xff] }
  0x13   :  { %v35_v38 = vld [vmem:[%s574_s1 + $0x68] sm:$0xff]  ;;  %v370_v39 = vpack.c.bf16 %v127_v36, %v126_v35  ;;  %v128_v41 = vld [vmem:[%s576_s3 + $0x60] sm:$0xff]  ;;  %v36_v43 = vld [vmem:[%s574_s1 + $0x70] sm:$0xff] }
  0x14   :  { %338 = vmatpush3.bf16.xpose.msra.mxu0 %v337_v16  ;;  %v349_v40 = vpack.c.bf16 %v35_v38, %v34_v37  ;;  %v129_v42 = vld [vmem:[%s576_s3 + $0x68] sm:$0xff]  ;;  %v37_v44 = vld [vmem:[%s574_s1 + $0x78] sm:$0xff]  ;;  %v130_v47 = vld [vmem:[%s576_s3 + $0x70] sm:$0xff] }
  0x15   :  { %339 = vmatprep.subr.bf16.mxu0 %v406_v2  ;;  %v373_v45 = vpack.c.bf16 %v129_v42, %v128_v41  ;;  %v352_v46 = vpack.c.bf16 %v37_v44, %v36_v43  ;;  %v131_v48 = vld [vmem:[%s576_s3 + $0x78] sm:$0xff]  ;;  %v21_v50 = vld [vmem:[%s573_s0] sm:$0xff]  ;;  %s409_s3 = smov [#allocation2]  }
  0x16   :  { %v376_v49 = vpack.c.bf16 %v131_v48, %v130_v47  ;;  %v224_v51 = vld [vmem:[%s575_s2] ss:$0 sm:$0xff]  ;;  %s216_s12 = sshll.u32 %s409_s3, 4  ;;  %s217_s12 = int_to_ptr.vmem [resolvable:$true] %s216_s12 }
  0x17   :  { %362 = vmatpush3.bf16.xpose.msra.mxu1 %v361_v21  ;;  %v225_v56 = vld [vmem:[%s577_s4] ss:$0 sm:$0xff]  ;;  %s382_s0 = scalar_lea.vmem %s217_s12, 128  ;;  %p387_p1 = scmp.lt.s32.totalorder %s217_s12, %s217_s12 }
  0x18   :  { %363 = vmatprep.subr.bf16.mxu1 %v406_v2  ;;  %p383_p0 = scmp.ne.s32.totalorder %s217_s12, %s382_s0  ;;  %p388_p2 = scmp.lt.s32.totalorder %s382_s0, %s382_s0 }
  0x1a   :  { %p389_p3 = por %p388_p2, %p387_p1 }
  0x1c   :  { %341 = vmatpush3.bf16.xpose.msra.mxu0 %v340_v22  ;;  %p390_p4 = pnand %p389_p3, %p383_p0 }
  0x1d   :  { %342 = vmatprep.subr.bf16.mxu0 %v406_v2 }
  0x1f   :  { %365 = vmatpush3.bf16.xpose.msra.mxu1 %v364_v27 }
  0x20   :  { %366 = vmatprep.subr.bf16.mxu1 %v406_v2 }
  0x24   :  { %344 = vmatpush3.bf16.xpose.msra.mxu0 %v343_v28 }
  0x25   :  { %345 = vmatprep.subr.bf16.mxu0 %v406_v2 }
  0x27   :  { %368 = vmatpush3.bf16.xpose.msra.mxu1 %v367_v33 }
  0x28   :  { %369 = vmatprep.subr.bf16.mxu1 %v406_v2 }
  0x2c   :  { %347 = vmatpush3.bf16.xpose.msra.mxu0 %v346_v34 }
  0x2d   :  { %348 = vmatprep.subr.bf16.mxu0 %v406_v2 }
  0x2f   :  { %371 = vmatpush3.bf16.xpose.msra.mxu1 %v370_v39 }
  0x30   :  { %372 = vmatprep.subr.bf16.mxu1 %v406_v2 }
  0x34   :  { %350 = vmatpush3.bf16.xpose.msra.mxu0 %v349_v40 }
  0x35   :  { %351 = vmatprep.subr.bf16.mxu0 %v406_v2 }
  0x37   :  { %374 = vmatpush3.bf16.xpose.msra.mxu1 %v373_v45 }
  0x38   :  { %375 = vmatprep.subr.bf16.mxu1 %v406_v2 }
  0x3c   :  { %353 = vmatpush3.bf16.xpose.msra.mxu0 %v352_v46 }
  0x3f   :  { %377 = vmatpush3.bf16.xpose.msra.mxu1 %v376_v49 }
  0x43   :  { %293 = vmatmul.mubr.f32.vlgmr.msra.gmra.mrb[0].mxu0 %v21_v50 }
 0x116   :  { %v111_v52 = vpop.f32.mrb[0].mxu0 }
 0x117   :  { %v112_v53 = vadd.f32 %v224_v51, %v111_v52  ;;  %v294_v54 = vpop.f32.mrb[1].mxu0 }
 0x119   :  { %v115_v55 = vmax.f32 %v112_v53, 0.0 }
 0x11b   :  { %328 = vmatmul.mubr.f32.vlgmr.msra.gmra.mrb[0].mxu1 %v115_v55 }
 0x1ee   :  { %v205_v57 = vpop.f32.mrb[0].mxu1 }
 0x1ef   :  { %v206_v58 = vadd.f32 %v225_v56, %v205_v57  ;;  %v329_v59 = vpop.f32.mrb[1].mxu1 }
 0x1f1   :  { %209 = vst [vmem:[#allocation2] sm:$0xff] %v206_v58 }
 0x1f2   :  { %393 = shalt.err (!%p390_p4)
}
 0x1f3   :  { %s394_s14 = scalar_lea.hbm %s578_s5, 128 }
 0x1f4   :  { %p395_p5 = scmp.ne.s32.totalorder %s578_s5, %s394_s14  ;;  %p398_p6 = scmp.lt.u32.totalorder %s394_s14, %s578_s5 }
 0x1f6   :  { %p400_p7 = pnand %p398_p6, %p395_p5 }
 0x1f8   :  { %403 = shalt.err (!%p400_p7)
}
 0x1f9   :  { %219 = dma.vmem_to_hbm [thread:$0]  %s217_s12, 128, %s578_s5, [#allocation3]  }
 0x1fa   :  { %404 = dma.done.wait [#allocation3], 128  }
 0x1fb   :  { %405 = vsyncadd [#allocation3], 4294967168 }
 0x1fc   :  { %223 = vsyncpa [#allocation3], 1 }

</bundles_post_ra>
